<compile_context>
chip_gen: v7x
topology: tpu7x:2x2x1
jax: 0.10.0
libtpu: 0.0.40
codegen_flags: <defaults>
</compile_context>

<pallas_src>
import jax
import jax.numpy as jnp
from jax.experimental import pallas as pl
from jax.experimental.pallas import tpu as pltpu


def _round_up(n, m):
    return ((n + m - 1) // m) * m


def _cdiv(a, b):
    return -(-a // b)


_ACTIVATIONS = {
    "relu": lambda x: jnp.maximum(x, 0.0),
    "leaky_relu": lambda x: jnp.where(x >= 0.0, x, 0.01 * x),
    "tanh": jnp.tanh,
}


def _make_world_model_kernel(num_hidden_layers, activation_name):
    """Builds the fused feature-major MLP kernel for a given depth/activation."""
    act = _ACTIVATIONS[activation_name]

    def kernel(*refs):
        # refs: xT, w1T, b1_col, [wT_i, b_i_col]*, woT, bo, out
        x_ref, w1_ref, b1_ref = refs[:3]
        hidden_refs = refs[3:3 + 2 * (num_hidden_layers - 1)]
        wo_ref, bo_ref, out_ref = refs[-3:]

        # Layer 1, fused concat + matmul, feature-major:
        #   (H1, D_in) @ (D_in, TB) -> (H1, TB), bias broadcast over lanes.
        h = jnp.dot(w1_ref[...], x_ref[...],
                    preferred_element_type=jnp.float32) + b1_ref[...]
        h = act(h)
        # TODO(synk): dropout is identity in eval mode; train-mode masking not
        # implemented.

        # Remaining hidden layers (all feature-major, lane-dense).
        for li in range(num_hidden_layers - 1):
            w_ref = hidden_refs[2 * li]
            b_ref = hidden_refs[2 * li + 1]
            h = act(jnp.dot(w_ref[...], h,
                            preferred_element_type=jnp.float32) + b_ref[...])

        # Reward head: (1, H_last) @ (H_last, TB) -> (1, TB).  Batch is on
        # lanes, so this is the lane-dense output block directly: unmasked
        # full-width stores, no relayout.
        r = jnp.dot(wo_ref[...], h, preferred_element_type=jnp.float32)
        out_ref[...] = (r + bo_ref[...]).astype(out_ref.dtype)

    return kernel


def world_model_forward(state, action, params, *, activation="relu",
                        block_cols=512, min_tiles=4):
    """Pallas-backed equivalent of WorldModel.forward.

    state : (B, state_dim) float32
    action: (B, action_dim) float32
    params: (w1, b1, w2, b2, ..., w_out, b_out) in math (in, out) convention.
    returns (B, 1) float32 predicted rewards.
    """
    if activation not in _ACTIVATIONS:
        raise ValueError(f"Unsupported activation function: {activation}")

    B, state_dim = state.shape
    _, action_dim = action.shape
    d_in = state_dim + action_dim
    num_hidden = (len(params) - 2) // 2

    # --- Feature-major (transposed) parameters; trace-time, tiny. -----------
    w1T = params[0].T                         # (H1, D_in)
    b1c = params[1].reshape(-1, 1)            # (H1, 1)
    hidden_ops = []
    for i in range(num_hidden - 1):
        hidden_ops.append(params[2 + 2 * i].T)                # (H_{i+1}, H_i)
        hidden_ops.append(params[3 + 2 * i].reshape(-1, 1))   # (H_{i+1}, 1)
    woT = params[-2].reshape(1, -1)           # (1, H_last)
    bo11 = params[-1].reshape(1, 1)           # (1, 1)

    # --- Feature-major input: one cheap HBM-side concat + transpose. --------
    xT = jnp.concatenate([state, action], axis=1).T           # (D_in, B)

    # --- Tile choice: lane tiles are multiples of 128; aim for >= min_tiles
    # grid steps (v7x megacore + DMA/compute overlap) while minimizing
    # batch padding.
    b128 = max(128, _round_up(B, 128))
    n_tiles = max(min_tiles, _cdiv(b128, block_cols))
    tb = _round_up(_cdiv(b128, n_tiles), 128)
    b_pad = _round_up(b128, tb)
    if b_pad != B:
        xT = jnp.pad(xT, ((0, 0), (0, b_pad - B)))
    grid = (b_pad // tb,)

    kernel = _make_world_model_kernel(num_hidden, activation)

    def resident(arr):
        # Constant index_map -> block stays pinned in VMEM across grid steps.
        return pl.BlockSpec(arr.shape, lambda i: (0, 0))

    in_specs = [
        pl.BlockSpec((d_in, tb), lambda i: (0, i)),   # streams, double-buffered
        resident(w1T), resident(b1c),
    ]
    operands = [xT, w1T, b1c]
    for arr in hidden_ops:
        in_specs.append(resident(arr))
        operands.append(arr)
    in_specs += [resident(woT), resident(bo11)]
    operands += [woT, bo11]

    out_flat = pl.pallas_call(
        kernel,
        out_shape=jax.ShapeDtypeStruct((1, b_pad), jnp.float32),
        grid=grid,
        in_specs=in_specs,
        out_specs=pl.BlockSpec((1, tb), lambda i: (0, i)),     # lane-dense output
        compiler_params=pltpu.CompilerParams(
            dimension_semantics=("parallel",)),                 # megacore on v7x
    )(*operands)

    # Layout plumbing back to the module's (B, 1) contract.
    return out_flat[0, :B].reshape(B, 1)


def init_params(key, input_dim, hidden_dims):
    """Deterministic parameter init matching the module's layer shapes."""
    dims = [input_dim] + list(hidden_dims)
    keys = jax.random.split(key, 2 * len(hidden_dims) + 2)
    params = []
    ki = 0
    for i in range(len(hidden_dims)):
        fan_in = dims[i]
        scale = 1.0 / jnp.sqrt(fan_in)
        w = jax.random.uniform(keys[ki], (dims[i], dims[i + 1]),
                               minval=-scale, maxval=scale, dtype=jnp.float32)
        ki += 1
        b = jax.random.uniform(keys[ki], (dims[i + 1],),
                               minval=-scale, maxval=scale, dtype=jnp.float32)
        ki += 1
        params.extend([w, b])
    # reward_output: Linear(hidden_dims[-1], 1)
    scale = 1.0 / jnp.sqrt(hidden_dims[-1])
    wo = jax.random.uniform(keys[ki], (hidden_dims[-1], 1),
                            minval=-scale, maxval=scale, dtype=jnp.float32)
    bo = jax.random.uniform(keys[ki + 1], (1,),
                            minval=-scale, maxval=scale, dtype=jnp.float32)
    params.extend([wo, bo])
    return tuple(params)


def reference_forward(state, action, params, activation="relu"):
    """Pure-JAX reference (mirrors the PyTorch forward, eval-mode dropout)."""
    act = _ACTIVATIONS[activation]
    num_hidden = (len(params) - 2) // 2
    x = jnp.concatenate([state, action], axis=1)
    for i in range(num_hidden):
        w, b = params[2 * i], params[2 * i + 1]
        x = act(x @ w + b)
    wo, bo = params[-2], params[-1]
    return x @ wo + bo


if __name__ == "__main__":
    key = jax.random.PRNGKey(0)
    k_state, k_action, k_params = jax.random.split(key, 3)

    batch = 2
    state_dim = 12
    action_dim = 4
    input_dim = state_dim + action_dim          # 16
    hidden_dims = [32, 32]

    state = jax.random.normal(k_state, (batch, state_dim), dtype=jnp.float32)
    action = jax.random.normal(k_action, (batch, action_dim), dtype=jnp.float32)
    params = init_params(k_params, input_dim, hidden_dims)

    out = world_model_forward(state, action, params)
    out = jax.block_until_ready(out)

    ref = reference_forward(state, action, params)
    assert out.shape == (batch, 1), out.shape
    assert jnp.allclose(out, ref, atol=1e-5, rtol=1e-5), (out, ref)

    print("KERNEL_OK")
</pallas_src>

<mosaic_0001>
module attributes {stable_mosaic.version = 11 : i64} {
  func.func @kernel(%arg0: i32, %arg1: memref<16x128xf32, #tpu.memory_space<vmem>>, %arg2: memref<32x16xf32, #tpu.memory_space<vmem>>, %arg3: memref<32x1xf32, #tpu.memory_space<vmem>>, %arg4: memref<32x32xf32, #tpu.memory_space<vmem>>, %arg5: memref<32x1xf32, #tpu.memory_space<vmem>>, %arg6: memref<1x32xf32, #tpu.memory_space<vmem>>, %arg7: memref<1x1xf32, #tpu.memory_space<vmem>>, %arg8: memref<1x128xf32, #tpu.memory_space<vmem>>) attributes {dimension_semantics = [#tpu.dimension_semantics<parallel>], iteration_bounds = array<i64: 1>, scalar_prefetch = 0 : i64, scratch_operands = 0 : i64, tpu.core_type = #tpu.core_type<tc>, window_params = [{transform_indices = @transform_0, window_bounds = array<i64: 16, 128>}, {pipeline_mode = #tpu.pipeline_mode<synchronous>, transform_indices = @transform_1, window_bounds = array<i64: 32, 16>}, {pipeline_mode = #tpu.pipeline_mode<synchronous>, transform_indices = @transform_2, window_bounds = array<i64: 32, 1>}, {pipeline_mode = #tpu.pipeline_mode<synchronous>, transform_indices = @transform_3, window_bounds = array<i64: 32, 32>}, {pipeline_mode = #tpu.pipeline_mode<synchronous>, transform_indices = @transform_4, window_bounds = array<i64: 32, 1>}, {pipeline_mode = #tpu.pipeline_mode<synchronous>, transform_indices = @transform_5, window_bounds = array<i64: 1, 32>}, {pipeline_mode = #tpu.pipeline_mode<synchronous>, transform_indices = @transform_6, window_bounds = array<i64: 1, 1>}, {transform_indices = @transform_7, window_bounds = array<i64: 1, 128>}]} {
    %c0 = arith.constant 0 : index
    %c0_0 = arith.constant 0 : index
    %0 = vector.load %arg2[%c0, %c0_0] : memref<32x16xf32, #tpu.memory_space<vmem>>, vector<32x16xf32>
    %c0_1 = arith.constant 0 : index
    %c0_2 = arith.constant 0 : index
    %1 = vector.load %arg1[%c0_1, %c0_2] : memref<16x128xf32, #tpu.memory_space<vmem>>, vector<16x128xf32>
    %cst = arith.constant dense<0.000000e+00> : vector<32x128xf32>
    %2 = tpu.matmul %0, %1, %cst {dimension_numbers = #tpu.dot_dimension_numbers<[1], [0], [0], [1], [0, 0, 1, 1], [], []>} : vector<32x16xf32>, vector<16x128xf32>, vector<32x128xf32> -> vector<32x128xf32>
    %c0_3 = arith.constant 0 : index
    %c0_4 = arith.constant 0 : index
    %3 = vector.load %arg3[%c0_3, %c0_4] : memref<32x1xf32, #tpu.memory_space<vmem>>, vector<32x1xf32>
    %4 = vector.broadcast %3 : vector<32x1xf32> to vector<32x128xf32>
    %5 = arith.addf %2, %4 : vector<32x128xf32>
    %cst_5 = arith.constant 0.000000e+00 : f32
    %6 = vector.broadcast %cst_5 : f32 to vector<32x128xf32>
    %7 = arith.maximumf %5, %6 : vector<32x128xf32>
    %c0_6 = arith.constant 0 : index
    %c0_7 = arith.constant 0 : index
    %8 = vector.load %arg4[%c0_6, %c0_7] : memref<32x32xf32, #tpu.memory_space<vmem>>, vector<32x32xf32>
    %cst_8 = arith.constant dense<0.000000e+00> : vector<32x128xf32>
    %9 = tpu.matmul %8, %7, %cst_8 {dimension_numbers = #tpu.dot_dimension_numbers<[1], [0], [0], [1], [0, 0, 1, 1], [], []>} : vector<32x32xf32>, vector<32x128xf32>, vector<32x128xf32> -> vector<32x128xf32>
    %c0_9 = arith.constant 0 : index
    %c0_10 = arith.constant 0 : index
    %10 = vector.load %arg5[%c0_9, %c0_10] : memref<32x1xf32, #tpu.memory_space<vmem>>, vector<32x1xf32>
    %11 = vector.broadcast %10 : vector<32x1xf32> to vector<32x128xf32>
    %12 = arith.addf %9, %11 : vector<32x128xf32>
    %cst_11 = arith.constant 0.000000e+00 : f32
    %13 = vector.broadcast %cst_11 : f32 to vector<32x128xf32>
    %14 = arith.maximumf %12, %13 : vector<32x128xf32>
    %c0_12 = arith.constant 0 : index
    %c0_13 = arith.constant 0 : index
    %15 = vector.load %arg6[%c0_12, %c0_13] : memref<1x32xf32, #tpu.memory_space<vmem>>, vector<1x32xf32>
    %cst_14 = arith.constant dense<0.000000e+00> : vector<1x128xf32>
    %16 = tpu.matmul %15, %14, %cst_14 {dimension_numbers = #tpu.dot_dimension_numbers<[1], [0], [0], [1], [0, 0, 1, 1], [], []>} : vector<1x32xf32>, vector<32x128xf32>, vector<1x128xf32> -> vector<1x128xf32>
    %c0_15 = arith.constant 0 : index
    %c0_16 = arith.constant 0 : index
    %17 = vector.load %arg7[%c0_15, %c0_16] : memref<1x1xf32, #tpu.memory_space<vmem>>, vector<1x1xf32>
    %18 = vector.broadcast %17 : vector<1x1xf32> to vector<1x128xf32>
    %19 = arith.addf %16, %18 : vector<1x128xf32>
    %c0_17 = arith.constant 0 : index
    %c0_18 = arith.constant 0 : index
    %20 = vector.load %arg8[%c0_17, %c0_18] : memref<1x128xf32, #tpu.memory_space<vmem>>, vector<1x128xf32>
    tpu.vector_store %arg8[%c0_17, %c0_18], %19 {strides = array<i32>} : memref<1x128xf32, #tpu.memory_space<vmem>>, vector<1x128xf32>,
    return
  }
  func.func @transform_0(%arg0: i32) -> (i32, i32) {
    %c0_i32 = arith.constant 0 : i32
    %c0_i32_0 = arith.constant 0 : i32
    return %c0_i32, %arg0 : i32, i32
  }
  func.func @transform_1(%arg0: i32) -> (i32, i32) {
    %c0_i32 = arith.constant 0 : i32
    %c0_i32_0 = arith.constant 0 : i32
    %c0_i32_1 = arith.constant 0 : i32
    return %c0_i32, %c0_i32_0 : i32, i32
  }
  func.func @transform_2(%arg0: i32) -> (i32, i32) {
    %c0_i32 = arith.constant 0 : i32
    %c0_i32_0 = arith.constant 0 : i32
    %c0_i32_1 = arith.constant 0 : i32
    return %c0_i32, %c0_i32_0 : i32, i32
  }
  func.func @transform_3(%arg0: i32) -> (i32, i32) {
    %c0_i32 = arith.constant 0 : i32
    %c0_i32_0 = arith.constant 0 : i32
    %c0_i32_1 = arith.constant 0 : i32
    return %c0_i32, %c0_i32_0 : i32, i32
  }
  func.func @transform_4(%arg0: i32) -> (i32, i32) {
    %c0_i32 = arith.constant 0 : i32
    %c0_i32_0 = arith.constant 0 : i32
    %c0_i32_1 = arith.constant 0 : i32
    return %c0_i32, %c0_i32_0 : i32, i32
  }
  func.func @transform_5(%arg0: i32) -> (i32, i32) {
    %c0_i32 = arith.constant 0 : i32
    %c0_i32_0 = arith.constant 0 : i32
    %c0_i32_1 = arith.constant 0 : i32
    return %c0_i32, %c0_i32_0 : i32, i32
  }
  func.func @transform_6(%arg0: i32) -> (i32, i32) {
    %c0_i32 = arith.constant 0 : i32
    %c0_i32_0 = arith.constant 0 : i32
    %c0_i32_1 = arith.constant 0 : i32
    return %c0_i32, %c0_i32_0 : i32, i32
  }
  func.func @transform_7(%arg0: i32) -> (i32, i32) {
    %c0_i32 = arith.constant 0 : i32
    %c0_i32_0 = arith.constant 0 : i32
    return %c0_i32, %arg0 : i32, i32
  }
}

</mosaic_0001>

<bundles_post_ra>
// kernel: tpu_custom_call.1
= control target key start
LH: loop header
LB: loop body
LE: loop exit
PB: predicated region body
PF: predicated region fallthrough
CT: control target
= control target key end

     0   :  { %s628_s0 = inlined_call_operand.vmem [shape: f32[16,128], index: 0, kind: input, shape index: {}]   ;;  %s629_s1 = inlined_call_operand.vmem [shape: f32[32,16], index: 1, kind: input, shape index: {}]   ;;  %s630_s2 = inlined_call_operand.vmem [shape: f32[32,1], index: 2, kind: input, shape index: {}]   ;;  %s631_s3 = inlined_call_operand.vmem [shape: f32[32,32], index: 3, kind: input, shape index: {}]   ;;  %s632_s4 = inlined_call_operand.vmem [shape: f32[32,1], index: 4, kind: input, shape index: {}]   ;;  %s633_s5 = inlined_call_operand.vmem [shape: f32[1,32], index: 5, kind: input, shape index: {}]   ;;  %s634_s6 = inlined_call_operand.<no memory space> [shape: f32[1,1], index: 6, kind: input, shape index: {}]   ;;  %s635_s7 = inlined_call_operand.hbm [shape: f32[1,128], index: 7, kind: output, shape index: {}]  }
   0x1   :  { %v12_v0 = vstv %s634_s6 }
   0x2   :  { %13 = vst [vmem:[#allocation2] sm:$0x1] %v12_v0 }
   0x3   :  { %v33_v1 = vld [vmem:[%s628_s0] sm:$0xff]  ;;  %v34_v2 = vld [vmem:[%s628_s0 + $0x8] sm:$0xff]  ;;  %vm59_vm0 = vcmask 130048   ;;  %v502_v5 = vmov 0   ;;  %v37_v7 = vld [vmem:[%s630_s2 + $0x10] sm:$0xff] }
   0x4   :  { %v29_v3 = vld [vmem:[%s629_s1] sm:$0xff]  ;;  %v453_v4 = vpack.c.bf16 %v34_v2, %v33_v1  ;;  %476 = vset.pattern.permute.xlu0 %v502_v5  ;;  %477 = vset.pattern.permute.xlu1 %v502_v5  ;;  %v30_v8 = vld [vmem:[%s629_s1 + $0x8] sm:$0xff]  ;;  %v31_v10 = vld [vmem:[%s629_s1 + $0x10] sm:$0xff] }
   0x5   :  { %422 = vmatprep.mubr.msk.f32.mxu0 %vm59_vm0, %v29_v3  ;;  %v35_v6 = vld [vmem:[%s630_s2] sm:$0xff]  ;;  %v36_v9 = vld [vmem:[%s630_s2 + $0x8] sm:$0xff]  ;;  %51 = vperm.xlu1 %477, %v37_v7   ;;  %v38_v11 = vld [vmem:[%s630_s2 + $0x18] sm:$0xff] }
   0x6   :  { %454 = vmatprep.subr.bf16.mxu0 %v453_v4  ;;  %41 = vperm.xlu0 %476, %v35_v6  }
   0x7   :  { %456 = vmatpush3.bf16.msra.mxu0 %v453_v4 }
   0x8   :  { %14 = vsyncpa [#allocation4], 0  ;;  %v32_v12 = vld [vmem:[%s629_s1 + $0x18] sm:$0xff]  ;;  %v165_v13 = vld [vmem:[%s632_s4] sm:$0xff]  ;;  %vm189_vm1 = vcmask 261120   ;;  %v503_v40 = vmov 0.0|0.0   ;;  %v298_v61 = vlaneseq }
   0x9   :  { %56 = vperm.xlu1 %477, %v38_v11   ;;  %v166_v14 = vld [vmem:[%s632_s4 + $0x8] sm:$0xff]  ;;  %v167_v15 = vld [vmem:[%s632_s4 + $0x10] sm:$0xff]  ;;  %v168_v16 = vld [vmem:[%s632_s4 + $0x18] sm:$0xff]  ;;  %465 = vmatprep.subr.bf16.mxu0 %v503_v40  ;;  %vm504_vm2 = vmmov 0   ;;  %v505_v41 = vmov 0.0   ;;  %s506_s11 = smov [#allocation3]  }
   0xa   :  { %423 = vmatmul.mubr.msk.f32.vlgmr.msra.gmra.mrb[0].mxu0 %vm59_vm0, %v30_v8  ;;  %46 = vperm.xlu0 %476, %v36_v9   ;;  %v292_v17 = vld [vmem:[#allocation2] sm:$0x1]  ;;  %v162_v37 = vld [vmem:[%s631_s3 + $0x8] sm:$0xff]  ;;  %v163_v38 = vld [vmem:[%s631_s3 + $0x10] sm:$0xff]  ;;  %v299_v62 = vshrl.u32 %v298_v61, 7  ;;  %s382_s0 = sshll.u32 %s506_s11, 4  ;;  %s383_s0 = int_to_ptr.vmem [resolvable:$true] %s382_s0 }
   0xb   :  { %425 = vmatprep.mubr.msk.f32.mxu0 %vm59_vm0, %v31_v10  ;;  %v161_v18 = vld [vmem:[%s631_s3] sm:$0xff]  ;;  %v164_v39 = vld [vmem:[%s631_s3 + $0x18] sm:$0xff]  ;;  %s478_s12 = scalar_lea.vmem %s383_s0, 16  ;;  %s482_s13 = scalar_lea.vmem %s383_s0, 32 }
   0xc   :  { %436 = vmatprep.mubr.msk.f32.mxu1 %vm189_vm1, %v161_v18  ;;  %v291_v60 = vld [vmem:[%s633_s5] sm:$0x1]  ;;  %v300_v63 = vsub.s32 0, %v299_v62  ;;  %p479_p0 = scmp.ne.s32.totalorder %s383_s0, %s478_s12  ;;  %p483_p1 = scmp.lt.s32.totalorder %s383_s0, %s383_s0 }
   0xd   :  { %176 = vperm.xlu1 %477, %v166_v14   ;;  %p484_p2 = scmp.lt.s32.totalorder %s482_s13, %s478_s12 }
   0xe   :  { %426 = vmatmul.mubr.msk.f32.gmra.mrb[2].mxu0 %vm59_vm0, %v32_v12  ;;  %171 = vperm.xlu0 %476, %v165_v13  }
   0xf   :  { %450 = vmatprep.mubr.msk.f32.mxu0 %vm504_vm2, %v505_v41  ;;  %p485_p3 = por %p484_p2, %p483_p1 }
  0x11   :  { %186 = vperm.xlu1 %477, %v168_v16   ;;  %p486_p4 = pnand %p485_p3, %p479_p0 }
  0x12   :  { %181 = vperm.xlu0 %476, %v167_v15  }
  0x16   :  { %295 = vperm.xlu0 %476, %v292_v17  }
  0x84   :  { %v52_v20 = vpop.permute.xlu1 %51 }
  0x85   :  { %v42_v19 = vpop.permute.xlu0 %41 }
  0x88   :  { %v57_v27 = vpop.permute.xlu1 %56 }
  0x89   :  { %v47_v21 = vpop.permute.xlu0 %46 }
  0x8c   :  { %v177_v42 = vpop.permute.xlu1 %176 }
  0x8d   :  { %v172_v43 = vpop.permute.xlu0 %171 }
  0x90   :  { %v187_v49 = vpop.permute.xlu1 %186 }
  0x91   :  { %v182_v52 = vpop.permute.xlu0 %181 }
  0x95   :  { %v296_v0 = vpop.permute.xlu0 %295 }
  0x96   :  { %v301_v1 = vrot.slane %v296_v0, %v300_v63 }
  0xdd   :  { %v424_v22 = vpop.f32.mrb[0].mxu0 }
  0xde   :  { %v144_v23 = vadd.f32 %v424_v22, %v47_v21  ;;  %v138_v24 = vpop.f32.mrb[1].mxu0 }
  0xdf   :  { %v139_v25 = vadd.f32 %v138_v24, %v42_v19 }
  0xe0   :  { %v158_v26 = vmax.f32 %v144_v23, 0.0 }
  0xe1   :  { %v157_v28 = vmax.f32 %v139_v25, 0.0  ;;  %v427_v29 = vpop.f32.mrb[2].mxu0 }
  0xe2   :  { %v154_v30 = vadd.f32 %v427_v29, %v57_v27  ;;  %v148_v31 = vpop.f32.mrb[3].mxu0 }
  0xe3   :  { %v149_v32 = vadd.f32 %v148_v31, %v52_v20  ;;  %v457_v33 = vpack.c.bf16 %v158_v26, %v157_v28 }
  0xe4   :  { %v160_v34 = vmax.f32 %v154_v30, 0.0 }
  0xe5   :  { %v159_v35 = vmax.f32 %v149_v32, 0.0  ;;  %458 = vmatprep.subr.bf16.mxu1 %v457_v33 }
  0xe6   :  { %460 = vmatpush3.bf16.msra.mxu1 %v457_v33 }
  0xe7   :  { %v461_v36 = vpack.c.bf16 %v160_v34, %v159_v35 }
  0xe9   :  { %462 = vmatprep.subr.bf16.mxu1 %v461_v36 }
  0xea   :  { %464 = vmatpush3.bf16.msra.mxu1 %v461_v36 }
  0xed   :  { %437 = vmatmul.mubr.msk.f32.vlgmr.msra.gmra.mrb[0].mxu1 %vm189_vm1, %v162_v37 }
  0xee   :  { %439 = vmatprep.mubr.msk.f32.mxu1 %vm189_vm1, %v163_v38 }
  0xf1   :  { %440 = vmatmul.mubr.msk.f32.gmra.mrb[2].mxu1 %vm189_vm1, %v164_v39 }
 0x1c0   :  { %v438_v44 = vpop.f32.mrb[0].mxu1 }
 0x1c1   :  { %v274_v45 = vadd.f32 %v438_v44, %v177_v42  ;;  %v268_v46 = vpop.f32.mrb[1].mxu1 }
 0x1c2   :  { %v269_v47 = vadd.f32 %v268_v46, %v172_v43 }
 0x1c3   :  { %v288_v48 = vmax.f32 %v274_v45, 0.0 }
 0x1c4   :  { %v287_v50 = vmax.f32 %v269_v47, 0.0  ;;  %v441_v51 = vpop.f32.mrb[2].mxu1 }
 0x1c5   :  { %v284_v53 = vadd.f32 %v441_v51, %v187_v49  ;;  %v278_v54 = vpop.f32.mrb[3].mxu1 }
 0x1c6   :  { %v466_v55 = vpack.c.bf16 %v288_v48, %v287_v50  ;;  %v279_v56 = vadd.f32 %v278_v54, %v182_v52 }
 0x1c7   :  { %v290_v57 = vmax.f32 %v284_v53, 0.0 }
 0x1c8   :  { %v289_v58 = vmax.f32 %v279_v56, 0.0  ;;  %467 = vmatpush3.bf16.msra.mxu0 %v466_v55 }
 0x1c9   :  { %468 = vmatprep.subr.bf16.mxu0 %v503_v40 }
 0x1ca   :  { %v469_v59 = vpack.c.bf16 %v290_v57, %v289_v58 }
 0x1cc   :  { %470 = vmatpush3.bf16.msra.mxu0 %v469_v59 }
 0x1cf   :  { %451 = vmatmul.mubr.msk.f32.vlgmr.msra.gmra.mrb[4].mxu0 %vm189_vm1, %v291_v60 }
 0x2a2   :  { %v371_v2 = vpop.f32.mrb[4].mxu0 }
 0x2a3   :  { %v372_v3 = vadd.f32 %v371_v2, %v301_v1  ;;  %v452_v4 = vpop.f32.mrb[5].mxu0 }
 0x2a5   :  { %375 = vst [vmem:[#allocation3] sm:$0x1] %v372_v3 }
 0x2a6   :  { %489 = shalt.err (!%p486_p4)
}
 0x2a7   :  { %s490_s15 = scalar_lea.hbm %s635_s7, 16 }
 0x2a8   :  { %p491_p5 = scmp.ne.s32.totalorder %s635_s7, %s490_s15  ;;  %p494_p6 = scmp.lt.u32.totalorder %s490_s15, %s635_s7 }
 0x2aa   :  { %p496_p7 = pnand %p494_p6, %p491_p5 }
 0x2ac   :  { %499 = shalt.err (!%p496_p7)
}
 0x2ad   :  { %385 = dma.vmem_to_hbm [thread:$0]  %s383_s0, 16, %s635_s7, [#allocation4]  }
 0x2ae   :  { %500 = dma.done.wait [#allocation4], 16  }
 0x2af   :  { %501 = vsyncadd [#allocation4], 4294967280 }
 0x2b0   :  { %389 = vsyncpa [#allocation4], 1 }

</bundles_post_ra>
